<compile_context>
chip_gen: v6e
topology: v6e:2x2x1
jax: 0.10.0
libtpu: 0.0.40
codegen_flags: <defaults>
</compile_context>

<pallas_src>
import math

import jax
import jax.numpy as jnp
import numpy as np
from jax.experimental import pallas as pl
from jax.experimental.pallas import tpu as pltpu


# ------------------------------ fused Pallas kernel ------------------------------ #

def _iwae_fused_kernel(xc_ref, c_ref, eps_ref,
                       w1_ref, b1_ref,
                       w2_ref, b2_ref,
                       w3132_ref, b3132_ref,
                       w3z_ref, w3c_ref, b3_ref,
                       w4_ref, b4_ref,
                       w5_ref, b5_ref,
                       mlv_ref, zp_ref):
    Bt = xc_ref.shape[0]                 # batch-tile rows (multiple of 8)
    L = w3132_ref.shape[1] // 2          # latent size
    F = w5_ref.shape[1]                  # sum(categories)
    H = w2_ref.shape[0]                  # hidden size
    K = zp_ref.shape[0] // Bt            # importance samples (keep a multiple of 8)

    xc = xc_ref[...]                     # (Bt, F+C)  -- x|c concatenated wrapper-side
    c = c_ref[...]                       # (Bt, C)

    # -------- encoder --------
    h1 = jnp.maximum(
        jnp.dot(xc, w1_ref[...], preferred_element_type=jnp.float32) + b1_ref[...], 0.0)
    h2 = jnp.maximum(
        jnp.dot(h1, w2_ref[...], preferred_element_type=jnp.float32) + b2_ref[...], 0.0)
    # fc31 / fc32 fused: [mu | logvar] in one matmul, stored as one lane-dense slab.
    mlv = jnp.dot(h2, w3132_ref[...], preferred_element_type=jnp.float32) + b3132_ref[...]
    mlv_ref[...] = mlv                                           # (Bt, 2L)
    mu = mlv[:, :L]
    logvar = mlv[:, L:]

    # -------- reparameterize: z = mu + exp(0.5*logvar) * eps --------
    std = jnp.exp(0.5 * logvar)                                  # (Bt, L)
    eps = eps_ref[...]                                           # (Bt*K, L)
    mu_rep = jnp.broadcast_to(mu[:, None, :], (Bt, K, L)).reshape(Bt * K, L)
    std_rep = jnp.broadcast_to(std[:, None, :], (Bt, K, L)).reshape(Bt * K, L)
    z = mu_rep + std_rep * eps                                   # (Bt*K, L)

    # -------- decoder: cat([z, c_rep]) @ W3 == z @ W3_z + (c @ W3_c + b3) --------
    c_proj = jnp.dot(c, w3c_ref[...], preferred_element_type=jnp.float32) + b3_ref[...]
    c_proj_rep = jnp.broadcast_to(c_proj[:, None, :], (Bt, K, H)).reshape(Bt * K, H)
    h3 = jnp.maximum(
        jnp.dot(z, w3z_ref[...], preferred_element_type=jnp.float32) + c_proj_rep, 0.0)
    h4 = jnp.maximum(
        jnp.dot(h3, w4_ref[...], preferred_element_type=jnp.float32) + b4_ref[...], 0.0)
    # fc5 heads concatenated along the output axis host-side -> one matmul.
    logits = jnp.dot(h4, w5_ref[...], preferred_element_type=jnp.float32) + b5_ref[...]

    # Softmax over the importance-sample axis (dim=1 in the reference module).
    lg = logits.reshape(Bt, K, F)
    m = jnp.max(lg, axis=1, keepdims=True)                       # (Bt, 1, F)
    e = jnp.exp(lg - m)                                          # (Bt, K, F)
    denom = jnp.sum(e, axis=1, keepdims=True)                    # (Bt, 1, F)
    probs = (e / denom).reshape(Bt * K, F)

    # Packed output slab [ z | probs ] via direct sub-slice stores (no in-vreg concat).
    zp_ref[:, :L] = z
    zp_ref[:, L:] = probs


# ----------------------------------- wrapper ------------------------------------- #

def _round_up(n, m):
    return (n + m - 1) // m * m


def _linear_params(key, fan_in, fan_out):
    kw, kb = jax.random.split(key)
    bound = 1.0 / math.sqrt(fan_in)
    w = jax.random.uniform(kw, (fan_in, fan_out), jnp.float32, -bound, bound)
    b = jax.random.uniform(kb, (1, fan_out), jnp.float32, -bound, bound)
    return w, b


class CategoricalIWAEPallas:
    def __init__(self, categories, latent_size, class_size, hidden_size, num_samples,
                 key=None):
        if key is None:
            key = jax.random.PRNGKey(0)
        self.categories = tuple(categories)
        self.feature_size = sum(categories)
        self.latent_size = latent_size
        self.class_size = class_size
        self.hidden_size = hidden_size
        self.num_samples = num_samples

        keys = jax.random.split(key, 7)
        F, C, H, L = self.feature_size, class_size, hidden_size, latent_size
        self.w1, self.b1 = _linear_params(keys[0], F + C, H)
        self.w2, self.b2 = _linear_params(keys[1], H, H)
        self.w31, self.b31 = _linear_params(keys[2], H, L)
        self.w32, self.b32 = _linear_params(keys[3], H, L)
        self.w3, self.b3 = _linear_params(keys[4], L + C, H)
        self.w4, self.b4 = _linear_params(keys[5], H, H)
        # fc5: per-category heads concatenated along the output axis.
        w5s, b5s = [], []
        head_keys = jax.random.split(keys[6], len(self.categories))
        for hk, n in zip(head_keys, self.categories):
            w, b = _linear_params(hk, H, n)
            w5s.append(w)
            b5s.append(b)
        self.w5 = jnp.concatenate(w5s, axis=1)                  # (H, F)
        self.b5 = jnp.concatenate(b5s, axis=1)                  # (1, F)

        # Kernel-side repacking (mathematically identical to the PyTorch layers):
        self.w3z, self.w3c = self.w3[:L], self.w3[L:]           # split fc3 over [z | c]
        self.w3132 = jnp.concatenate([self.w31, self.w32], axis=1)   # (H, 2L)
        self.b3132 = jnp.concatenate([self.b31, self.b32], axis=1)   # (1, 2L)

    def forward(self, x, c, k, key):
        B = x.shape[0]
        F, C, L, H = self.feature_size, self.class_size, self.latent_size, self.hidden_size

        # eps ~ N(0,1) drawn XLA-side (matches torch rsample); consumed by kernel + ref.
        eps = jax.random.normal(key, (B, k, L), dtype=jnp.float32)

        # Batch tiling: multiple-of-8 sublanes, and ALWAYS >= 2 tiles so that
        # dimension_semantics=("parallel",) spans both v7x TensorCores.
        B_pad = _round_up(max(B, 1), 8)
        B_pad = max(B_pad, 16)
        B_tile = min(256, _round_up(B_pad // 2, 8))
        B_pad = _round_up(B_pad, B_tile)
        nb = B_pad // B_tile

        xc = jnp.concatenate([x, c], axis=1)                    # lane-concat once, XLA-side
        if B_pad != B:
            pad = B_pad - B
            xc = jnp.pad(xc, ((0, pad), (0, 0)))
            c_p = jnp.pad(c, ((0, pad), (0, 0)))
            eps_p = jnp.pad(eps, ((0, pad), (0, 0), (0, 0)))
        else:
            c_p, eps_p = c, eps
        eps_flat = eps_p.reshape(B_pad * k, L)

        weights = (self.w1, self.b1, self.w2, self.b2,
                   self.w3132, self.b3132,
                   self.w3z, self.w3c, self.b3,
                   self.w4, self.b4, self.w5, self.b5)

        # Weights/biases: full-array blocks with constant index_maps -> DMA'd once,
        # VMEM-resident across all batch tiles.
        def full(a):
            return pl.BlockSpec(a.shape, lambda i: (0,) * a.ndim)

        # Explicit VMEM budget (v5e's scoped default is only 16 MiB).
        weight_bytes = sum(int(np.prod(w.shape)) * 4 for w in weights)
        act_bytes = 4 * B_tile * k * (4 * H + 3 * F + 6 * L)    # generous live-intermediate bound
        vmem_limit = int(min(2 * weight_bytes + 4 * act_bytes + (4 << 20), 100 << 20))

        grid_spec = pltpu.PrefetchScalarGridSpec(
            num_scalar_prefetch=0,
            grid=(nb,),
            in_specs=[pl.BlockSpec((B_tile, F + C), lambda i: (i, 0)),
                      pl.BlockSpec((B_tile, C), lambda i: (i, 0)),
                      pl.BlockSpec((B_tile * k, L), lambda i: (i, 0))]
                     + [full(w) for w in weights],
            out_specs=(pl.BlockSpec((B_tile, 2 * L), lambda i: (i, 0)),
                       pl.BlockSpec((B_tile * k, L + F), lambda i: (i, 0))),
        )

        mlv, zp = pl.pallas_call(
            _iwae_fused_kernel,
            grid_spec=grid_spec,
            out_shape=(jax.ShapeDtypeStruct((B_pad, 2 * L), jnp.float32),
                       jax.ShapeDtypeStruct((B_pad * k, L + F), jnp.float32)),
            compiler_params=pltpu.CompilerParams(
                dimension_semantics=("parallel",),   # 2x on v7x's dual TensorCores
                vmem_limit_bytes=vmem_limit),
        )(xc, c_p, eps_flat, *weights)

        mu = mlv[:B, :L]
        logvar = mlv[:B, L:]
        zp = zp.reshape(B_pad, k, L + F)[:B]
        z = zp[:, :, :L]
        probs_cat = zp[:, :, L:]
        splits = np.cumsum(self.categories)[:-1].tolist()
        probs = jnp.split(probs_cat, splits, axis=2)
        return probs, mu, logvar, z, eps

    # Pure-JAX reference replicating the PyTorch module math (consumes the same eps).
    def forward_ref(self, x, c, eps):
        inp = jnp.concatenate([x, c], axis=1)
        h1 = jax.nn.relu(inp @ self.w1 + self.b1)
        h2 = jax.nn.relu(h1 @ self.w2 + self.b2)
        mu = h2 @ self.w31 + self.b31
        logvar = h2 @ self.w32 + self.b32
        std = jnp.exp(0.5 * logvar)
        z = mu[:, None, :] + std[:, None, :] * eps
        c_rep = jnp.repeat(c[:, None, :], eps.shape[1], axis=1)
        dec_in = jnp.concatenate([z, c_rep], axis=-1)
        h3 = jax.nn.relu(dec_in @ self.w3 + self.b3)
        h4 = jax.nn.relu(h3 @ self.w4 + self.b4)
        logits = h4 @ self.w5 + self.b5
        probs_cat = jax.nn.softmax(logits, axis=1)               # over the K axis (dim=1)
        splits = np.cumsum(self.categories)[:-1].tolist()
        probs = jnp.split(probs_cat, splits, axis=2)
        return probs, mu, logvar, z


# ------------------------------------- main --------------------------------------- #

if __name__ == "__main__":
    categories = (4, 3, 5)          # feature_size = 12
    latent_size = 8
    class_size = 4
    hidden_size = 32
    num_samples = 8                 # k (multiple of 8 keeps the K-axis reduce sublane-aligned)
    batch = 8

    root = jax.random.PRNGKey(0)
    k_model, k_x, k_c, k_eps = jax.random.split(root, 4)

    model = CategoricalIWAEPallas(categories, latent_size, class_size, hidden_size,
                                  num_samples, key=k_model)

    # x: concatenation of one-hot groups, as the original model's data.
    x_parts = []
    idx_keys = jax.random.split(k_x, len(categories))
    for ik, n in zip(idx_keys, categories):
        idx = jax.random.randint(ik, (batch,), 0, n)
        x_parts.append(jax.nn.one_hot(idx, n, dtype=jnp.float32))
    x = jnp.concatenate(x_parts, axis=1)                         # (B, 12)
    c = jax.random.normal(k_c, (batch, class_size), dtype=jnp.float32)

    probs, mu, logvar, z, eps = model.forward(x, c, num_samples, key=k_eps)
    jax.block_until_ready((probs, mu, logvar, z))

    # verify against the pure-JAX reference using the same eps
    probs_r, mu_r, logvar_r, z_r = model.forward_ref(x, c, eps)
    np.testing.assert_allclose(np.asarray(mu), np.asarray(mu_r), rtol=1e-4, atol=1e-4)
    np.testing.assert_allclose(np.asarray(logvar), np.asarray(logvar_r), rtol=1e-4, atol=1e-4)
    np.testing.assert_allclose(np.asarray(z), np.asarray(z_r), rtol=1e-4, atol=1e-4)
    for p, pr in zip(probs, probs_r):
        np.testing.assert_allclose(np.asarray(p), np.asarray(pr), rtol=1e-4, atol=1e-4)

    assert probs[0].shape == (batch, num_samples, categories[0])
    assert mu.shape == (batch, latent_size)
    assert z.shape == (batch, num_samples, latent_size)

    print("KERNEL_OK")
</pallas_src>

<mosaic_0001>
module attributes {stable_mosaic.version = 11 : i64} {
  func.func @_iwae_fused_kernel(%arg0: i32, %arg1: memref<8x16xf32, #tpu.memory_space<vmem>>, %arg2: memref<8x4xf32, #tpu.memory_space<vmem>>, %arg3: memref<64x8xf32, #tpu.memory_space<vmem>>, %arg4: memref<16x32xf32, #tpu.memory_space<vmem>>, %arg5: memref<1x32xf32, #tpu.memory_space<vmem>>, %arg6: memref<32x32xf32, #tpu.memory_space<vmem>>, %arg7: memref<1x32xf32, #tpu.memory_space<vmem>>, %arg8: memref<32x16xf32, #tpu.memory_space<vmem>>, %arg9: memref<1x16xf32, #tpu.memory_space<vmem>>, %arg10: memref<8x32xf32, #tpu.memory_space<vmem>>, %arg11: memref<4x32xf32, #tpu.memory_space<vmem>>, %arg12: memref<1x32xf32, #tpu.memory_space<vmem>>, %arg13: memref<32x32xf32, #tpu.memory_space<vmem>>, %arg14: memref<1x32xf32, #tpu.memory_space<vmem>>, %arg15: memref<32x12xf32, #tpu.memory_space<vmem>>, %arg16: memref<1x12xf32, #tpu.memory_space<vmem>>, %arg17: memref<8x16xf32, #tpu.memory_space<vmem>>, %arg18: memref<64x20xf32, #tpu.memory_space<vmem>>) attributes {dimension_semantics = [#tpu.dimension_semantics<parallel>], iteration_bounds = array<i64: 2>, scalar_prefetch = 0 : i64, scratch_operands = 0 : i64, tpu.core_type = #tpu.core_type<tc>, window_params = [{transform_indices = @transform_0, window_bounds = array<i64: 8, 16>}, {transform_indices = @transform_1, window_bounds = array<i64: 8, 4>}, {transform_indices = @transform_2, window_bounds = array<i64: 64, 8>}, {pipeline_mode = #tpu.pipeline_mode<synchronous>, transform_indices = @transform_3, window_bounds = array<i64: 16, 32>}, {pipeline_mode = #tpu.pipeline_mode<synchronous>, transform_indices = @transform_4, window_bounds = array<i64: 1, 32>}, {pipeline_mode = #tpu.pipeline_mode<synchronous>, transform_indices = @transform_5, window_bounds = array<i64: 32, 32>}, {pipeline_mode = #tpu.pipeline_mode<synchronous>, transform_indices = @transform_6, window_bounds = array<i64: 1, 32>}, {pipeline_mode = #tpu.pipeline_mode<synchronous>, transform_indices = @transform_7, window_bounds = array<i64: 32, 16>}, {pipeline_mode = #tpu.pipeline_mode<synchronous>, transform_indices = @transform_8, window_bounds = array<i64: 1, 16>}, {pipeline_mode = #tpu.pipeline_mode<synchronous>, transform_indices = @transform_9, window_bounds = array<i64: 8, 32>}, {pipeline_mode = #tpu.pipeline_mode<synchronous>, transform_indices = @transform_10, window_bounds = array<i64: 4, 32>}, {pipeline_mode = #tpu.pipeline_mode<synchronous>, transform_indices = @transform_11, window_bounds = array<i64: 1, 32>}, {pipeline_mode = #tpu.pipeline_mode<synchronous>, transform_indices = @transform_12, window_bounds = array<i64: 32, 32>}, {pipeline_mode = #tpu.pipeline_mode<synchronous>, transform_indices = @transform_13, window_bounds = array<i64: 1, 32>}, {pipeline_mode = #tpu.pipeline_mode<synchronous>, transform_indices = @transform_14, window_bounds = array<i64: 32, 12>}, {pipeline_mode = #tpu.pipeline_mode<synchronous>, transform_indices = @transform_15, window_bounds = array<i64: 1, 12>}, {transform_indices = @transform_16, window_bounds = array<i64: 8, 16>}, {transform_indices = @transform_17, window_bounds = array<i64: 64, 20>}]} {
    %c0 = arith.constant 0 : index
    %c0_0 = arith.constant 0 : index
    %0 = vector.load %arg1[%c0, %c0_0] : memref<8x16xf32, #tpu.memory_space<vmem>>, vector<8x16xf32>
    %c0_1 = arith.constant 0 : index
    %c0_2 = arith.constant 0 : index
    %1 = vector.load %arg2[%c0_1, %c0_2] : memref<8x4xf32, #tpu.memory_space<vmem>>, vector<8x4xf32>
    %c0_3 = arith.constant 0 : index
    %c0_4 = arith.constant 0 : index
    %2 = vector.load %arg4[%c0_3, %c0_4] : memref<16x32xf32, #tpu.memory_space<vmem>>, vector<16x32xf32>
    %cst = arith.constant dense<0.000000e+00> : vector<8x32xf32>
    %3 = tpu.matmul %0, %2, %cst {dimension_numbers = #tpu.dot_dimension_numbers<[1], [0], [0], [1], [0, 0, 1, 1], [], []>} : vector<8x16xf32>, vector<16x32xf32>, vector<8x32xf32> -> vector<8x32xf32>
    %c0_5 = arith.constant 0 : index
    %c0_6 = arith.constant 0 : index
    %4 = vector.load %arg5[%c0_5, %c0_6] : memref<1x32xf32, #tpu.memory_space<vmem>>, vector<1x32xf32>
    %5 = vector.broadcast %4 : vector<1x32xf32> to vector<8x32xf32>
    %6 = arith.addf %3, %5 : vector<8x32xf32>
    %cst_7 = arith.constant 0.000000e+00 : f32
    %7 = vector.broadcast %cst_7 : f32 to vector<8x32xf32>
    %8 = arith.maximumf %6, %7 : vector<8x32xf32>
    %c0_8 = arith.constant 0 : index
    %c0_9 = arith.constant 0 : index
    %9 = vector.load %arg6[%c0_8, %c0_9] : memref<32x32xf32, #tpu.memory_space<vmem>>, vector<32x32xf32>
    %cst_10 = arith.constant dense<0.000000e+00> : vector<8x32xf32>
    %10 = tpu.matmul %8, %9, %cst_10 {dimension_numbers = #tpu.dot_dimension_numbers<[1], [0], [0], [1], [0, 0, 1, 1], [], []>} : vector<8x32xf32>, vector<32x32xf32>, vector<8x32xf32> -> vector<8x32xf32>
    %c0_11 = arith.constant 0 : index
    %c0_12 = arith.constant 0 : index
    %11 = vector.load %arg7[%c0_11, %c0_12] : memref<1x32xf32, #tpu.memory_space<vmem>>, vector<1x32xf32>
    %12 = vector.broadcast %11 : vector<1x32xf32> to vector<8x32xf32>
    %13 = arith.addf %10, %12 : vector<8x32xf32>
    %cst_13 = arith.constant 0.000000e+00 : f32
    %14 = vector.broadcast %cst_13 : f32 to vector<8x32xf32>
    %15 = arith.maximumf %13, %14 : vector<8x32xf32>
    %c0_14 = arith.constant 0 : index
    %c0_15 = arith.constant 0 : index
    %16 = vector.load %arg8[%c0_14, %c0_15] : memref<32x16xf32, #tpu.memory_space<vmem>>, vector<32x16xf32>
    %cst_16 = arith.constant dense<0.000000e+00> : vector<8x16xf32>
    %17 = tpu.matmul %15, %16, %cst_16 {dimension_numbers = #tpu.dot_dimension_numbers<[1], [0], [0], [1], [0, 0, 1, 1], [], []>} : vector<8x32xf32>, vector<32x16xf32>, vector<8x16xf32> -> vector<8x16xf32>
    %c0_17 = arith.constant 0 : index
    %c0_18 = arith.constant 0 : index
    %18 = vector.load %arg9[%c0_17, %c0_18] : memref<1x16xf32, #tpu.memory_space<vmem>>, vector<1x16xf32>
    %19 = vector.broadcast %18 : vector<1x16xf32> to vector<8x16xf32>
    %20 = arith.addf %17, %19 : vector<8x16xf32>
    %c0_19 = arith.constant 0 : index
    %c0_20 = arith.constant 0 : index
    %21 = vector.load %arg17[%c0_19, %c0_20] : memref<8x16xf32, #tpu.memory_space<vmem>>, vector<8x16xf32>
    tpu.vector_store %arg17[%c0_19, %c0_20], %20 {strides = array<i32>} : memref<8x16xf32, #tpu.memory_space<vmem>>, vector<8x16xf32>,
    %22 = vector.extract_strided_slice %20 {offsets = [0, 0], sizes = [8, 8], strides = [1, 1]} : vector<8x16xf32> to vector<8x8xf32>
    %23 = vector.extract_strided_slice %20 {offsets = [0, 8], sizes = [8, 8], strides = [1, 1]} : vector<8x16xf32> to vector<8x8xf32>
    %cst_21 = arith.constant 5.000000e-01 : f32
    %24 = vector.broadcast %cst_21 : f32 to vector<8x8xf32>
    %25 = arith.mulf %24, %23 : vector<8x8xf32>
    %26 = math.exp %25 : vector<8x8xf32>
    %c0_22 = arith.constant 0 : index
    %c0_23 = arith.constant 0 : index
    %27 = vector.load %arg3[%c0_22, %c0_23] : memref<64x8xf32, #tpu.memory_space<vmem>>, vector<64x8xf32>
    %28 = vector.shape_cast %22 : vector<8x8xf32> to vector<8x1x8xf32>
    %29 = vector.shape_cast %28 : vector<8x1x8xf32> to vector<8x1x8xf32>
    %30 = vector.broadcast %29 : vector<8x1x8xf32> to vector<8x8x8xf32>
    %31 = vector.shape_cast %30 : vector<8x8x8xf32> to vector<64x8xf32>
    %32 = vector.shape_cast %26 : vector<8x8xf32> to vector<8x1x8xf32>
    %33 = vector.shape_cast %32 : vector<8x1x8xf32> to vector<8x1x8xf32>
    %34 = vector.broadcast %33 : vector<8x1x8xf32> to vector<8x8x8xf32>
    %35 = vector.shape_cast %34 : vector<8x8x8xf32> to vector<64x8xf32>
    %36 = arith.mulf %35, %27 : vector<64x8xf32>
    %37 = arith.addf %31, %36 : vector<64x8xf32>
    %c0_24 = arith.constant 0 : index
    %c0_25 = arith.constant 0 : index
    %38 = vector.load %arg11[%c0_24, %c0_25] : memref<4x32xf32, #tpu.memory_space<vmem>>, vector<4x32xf32>
    %cst_26 = arith.constant dense<0.000000e+00> : vector<8x32xf32>
    %39 = tpu.matmul %1, %38, %cst_26 {dimension_numbers = #tpu.dot_dimension_numbers<[1], [0], [0], [1], [0, 0, 1, 1], [], []>} : vector<8x4xf32>, vector<4x32xf32>, vector<8x32xf32> -> vector<8x32xf32>
    %c0_27 = arith.constant 0 : index
    %c0_28 = arith.constant 0 : index
    %40 = vector.load %arg12[%c0_27, %c0_28] : memref<1x32xf32, #tpu.memory_space<vmem>>, vector<1x32xf32>
    %41 = vector.broadcast %40 : vector<1x32xf32> to vector<8x32xf32>
    %42 = arith.addf %39, %41 : vector<8x32xf32>
    %43 = vector.shape_cast %42 : vector<8x32xf32> to vector<8x1x32xf32>
    %44 = vector.shape_cast %43 : vector<8x1x32xf32> to vector<8x1x32xf32>
    %45 = vector.broadcast %44 : vector<8x1x32xf32> to vector<8x8x32xf32>
    %46 = vector.shape_cast %45 : vector<8x8x32xf32> to vector<64x32xf32>
    %c0_29 = arith.constant 0 : index
    %c0_30 = arith.constant 0 : index
    %47 = vector.load %arg10[%c0_29, %c0_30] : memref<8x32xf32, #tpu.memory_space<vmem>>, vector<8x32xf32>
    %cst_31 = arith.constant dense<0.000000e+00> : vector<64x32xf32>
    %48 = tpu.matmul %37, %47, %cst_31 {dimension_numbers = #tpu.dot_dimension_numbers<[1], [0], [0], [1], [0, 0, 1, 1], [], []>} : vector<64x8xf32>, vector<8x32xf32>, vector<64x32xf32> -> vector<64x32xf32>
    %49 = arith.addf %48, %46 : vector<64x32xf32>
    %cst_32 = arith.constant 0.000000e+00 : f32
    %50 = vector.broadcast %cst_32 : f32 to vector<64x32xf32>
    %51 = arith.maximumf %49, %50 : vector<64x32xf32>
    %c0_33 = arith.constant 0 : index
    %c0_34 = arith.constant 0 : index
    %52 = vector.load %arg13[%c0_33, %c0_34] : memref<32x32xf32, #tpu.memory_space<vmem>>, vector<32x32xf32>
    %cst_35 = arith.constant dense<0.000000e+00> : vector<64x32xf32>
    %53 = tpu.matmul %51, %52, %cst_35 {dimension_numbers = #tpu.dot_dimension_numbers<[1], [0], [0], [1], [0, 0, 1, 1], [], []>} : vector<64x32xf32>, vector<32x32xf32>, vector<64x32xf32> -> vector<64x32xf32>
    %c0_36 = arith.constant 0 : index
    %c0_37 = arith.constant 0 : index
    %54 = vector.load %arg14[%c0_36, %c0_37] : memref<1x32xf32, #tpu.memory_space<vmem>>, vector<1x32xf32>
    %55 = vector.broadcast %54 : vector<1x32xf32> to vector<64x32xf32>
    %56 = arith.addf %53, %55 : vector<64x32xf32>
    %cst_38 = arith.constant 0.000000e+00 : f32
    %57 = vector.broadcast %cst_38 : f32 to vector<64x32xf32>
    %58 = arith.maximumf %56, %57 : vector<64x32xf32>
    %c0_39 = arith.constant 0 : index
    %c0_40 = arith.constant 0 : index
    %59 = vector.load %arg15[%c0_39, %c0_40] : memref<32x12xf32, #tpu.memory_space<vmem>>, vector<32x12xf32>
    %cst_41 = arith.constant dense<0.000000e+00> : vector<64x12xf32>
    %60 = tpu.matmul %58, %59, %cst_41 {dimension_numbers = #tpu.dot_dimension_numbers<[1], [0], [0], [1], [0, 0, 1, 1], [], []>} : vector<64x32xf32>, vector<32x12xf32>, vector<64x12xf32> -> vector<64x12xf32>
    %c0_42 = arith.constant 0 : index
    %c0_43 = arith.constant 0 : index
    %61 = vector.load %arg16[%c0_42, %c0_43] : memref<1x12xf32, #tpu.memory_space<vmem>>, vector<1x12xf32>
    %62 = vector.broadcast %61 : vector<1x12xf32> to vector<64x12xf32>
    %63 = arith.addf %60, %62 : vector<64x12xf32>
    %64 = vector.shape_cast %63 : vector<64x12xf32> to vector<8x8x12xf32>
    %cst_44 = arith.constant dense<0xFF800000> : vector<8x12xf32>
    %65 = vector.multi_reduction <maximumf>, %64, %cst_44 [1] : vector<8x8x12xf32> to vector<8x12xf32>
    %66 = vector.shape_cast %65 : vector<8x12xf32> to vector<8x1x12xf32>
    %67 = vector.broadcast %66 : vector<8x1x12xf32> to vector<8x8x12xf32>
    %68 = arith.subf %64, %67 : vector<8x8x12xf32>
    %69 = math.exp %68 : vector<8x8x12xf32>
    %cst_45 = arith.constant dense<0.000000e+00> : vector<8x12xf32>
    %70 = vector.multi_reduction <add>, %69, %cst_45 [1] : vector<8x8x12xf32> to vector<8x12xf32>
    %71 = vector.shape_cast %70 : vector<8x12xf32> to vector<8x1x12xf32>
    %72 = vector.broadcast %71 : vector<8x1x12xf32> to vector<8x8x12xf32>
    %73 = arith.divf %69, %72 : vector<8x8x12xf32>
    %74 = vector.shape_cast %73 : vector<8x8x12xf32> to vector<64x12xf32>
    %c0_46 = arith.constant 0 : index
    %c0_47 = arith.constant 0 : index
    %75 = vector.load %arg18[%c0_46, %c0_47] : memref<64x20xf32, #tpu.memory_space<vmem>>, vector<64x8xf32>
    tpu.vector_store %arg18[%c0_46, %c0_47], %37 {strides = array<i32>} : memref<64x20xf32, #tpu.memory_space<vmem>>, vector<64x8xf32>,
    %c0_48 = arith.constant 0 : index
    %c8 = arith.constant 8 : index
    %76 = vector.load %arg18[%c0_48, %c8] : memref<64x20xf32, #tpu.memory_space<vmem>>, vector<64x12xf32>
    tpu.vector_store %arg18[%c0_48, %c8], %74 {strides = array<i32>} : memref<64x20xf32, #tpu.memory_space<vmem>>, vector<64x12xf32>,
    return
  }
  func.func @transform_0(%arg0: i32) -> (i32, i32) {
    %c0_i32 = arith.constant 0 : i32
    %c0_i32_0 = arith.constant 0 : i32
    return %arg0, %c0_i32 : i32, i32
  }
  func.func @transform_1(%arg0: i32) -> (i32, i32) {
    %c0_i32 = arith.constant 0 : i32
    %c0_i32_0 = arith.constant 0 : i32
    return %arg0, %c0_i32 : i32, i32
  }
  func.func @transform_2(%arg0: i32) -> (i32, i32) {
    %c0_i32 = arith.constant 0 : i32
    %c0_i32_0 = arith.constant 0 : i32
    return %arg0, %c0_i32 : i32, i32
  }
  func.func @transform_3(%arg0: i32) -> (i32, i32) {
    %c0_i32 = arith.constant 0 : i32
    %c0_i32_0 = arith.constant 0 : i32
    %c0_i32_1 = arith.constant 0 : i32
    return %c0_i32, %c0_i32_0 : i32, i32
  }
  func.func @transform_4(%arg0: i32) -> (i32, i32) {
    %c0_i32 = arith.constant 0 : i32
    %c0_i32_0 = arith.constant 0 : i32
    %c0_i32_1 = arith.constant 0 : i32
    return %c0_i32, %c0_i32_0 : i32, i32
  }
  func.func @transform_5(%arg0: i32) -> (i32, i32) {
    %c0_i32 = arith.constant 0 : i32
    %c0_i32_0 = arith.constant 0 : i32
    %c0_i32_1 = arith.constant 0 : i32
    return %c0_i32, %c0_i32_0 : i32, i32
  }
  func.func @transform_6(%arg0: i32) -> (i32, i32) {
    %c0_i32 = arith.constant 0 : i32
    %c0_i32_0 = arith.constant 0 : i32
    %c0_i32_1 = arith.constant 0 : i32
    return %c0_i32, %c0_i32_0 : i32, i32
  }
  func.func @transform_7(%arg0: i32) -> (i32, i32) {
    %c0_i32 = arith.constant 0 : i32
    %c0_i32_0 = arith.constant 0 : i32
    %c0_i32_1 = arith.constant 0 : i32
    return %c0_i32, %c0_i32_0 : i32, i32
  }
  func.func @transform_8(%arg0: i32) -> (i32, i32) {
    %c0_i32 = arith.constant 0 : i32
    %c0_i32_0 = arith.constant 0 : i32
    %c0_i32_1 = arith.constant 0 : i32
    return %c0_i32, %c0_i32_0 : i32, i32
  }
  func.func @transform_9(%arg0: i32) -> (i32, i32) {
    %c0_i32 = arith.constant 0 : i32
    %c0_i32_0 = arith.constant 0 : i32
    %c0_i32_1 = arith.constant 0 : i32
    return %c0_i32, %c0_i32_0 : i32, i32
  }
  func.func @transform_10(%arg0: i32) -> (i32, i32) {
    %c0_i32 = arith.constant 0 : i32
    %c0_i32_0 = arith.constant 0 : i32
    %c0_i32_1 = arith.constant 0 : i32
    return %c0_i32, %c0_i32_0 : i32, i32
  }
  func.func @transform_11(%arg0: i32) -> (i32, i32) {
    %c0_i32 = arith.constant 0 : i32
    %c0_i32_0 = arith.constant 0 : i32
    %c0_i32_1 = arith.constant 0 : i32
    return %c0_i32, %c0_i32_0 : i32, i32
  }
  func.func @transform_12(%arg0: i32) -> (i32, i32) {
    %c0_i32 = arith.constant 0 : i32
    %c0_i32_0 = arith.constant 0 : i32
    %c0_i32_1 = arith.constant 0 : i32
    return %c0_i32, %c0_i32_0 : i32, i32
  }
  func.func @transform_13(%arg0: i32) -> (i32, i32) {
    %c0_i32 = arith.constant 0 : i32
    %c0_i32_0 = arith.constant 0 : i32
    %c0_i32_1 = arith.constant 0 : i32
    return %c0_i32, %c0_i32_0 : i32, i32
  }
  func.func @transform_14(%arg0: i32) -> (i32, i32) {
    %c0_i32 = arith.constant 0 : i32
    %c0_i32_0 = arith.constant 0 : i32
    %c0_i32_1 = arith.constant 0 : i32
    return %c0_i32, %c0_i32_0 : i32, i32
  }
  func.func @transform_15(%arg0: i32) -> (i32, i32) {
    %c0_i32 = arith.constant 0 : i32
    %c0_i32_0 = arith.constant 0 : i32
    %c0_i32_1 = arith.constant 0 : i32
    return %c0_i32, %c0_i32_0 : i32, i32
  }
  func.func @transform_16(%arg0: i32) -> (i32, i32) {
    %c0_i32 = arith.constant 0 : i32
    %c0_i32_0 = arith.constant 0 : i32
    return %arg0, %c0_i32 : i32, i32
  }
  func.func @transform_17(%arg0: i32) -> (i32, i32) {
    %c0_i32 = arith.constant 0 : i32
    %c0_i32_0 = arith.constant 0 : i32
    return %arg0, %c0_i32 : i32, i32
  }
}

</mosaic_0001>

<bundles_post_ra>
// kernel: tpu_custom_call.1
= control target key start
LH: loop header
LB: loop body
LE: loop exit
PB: predicated region body
PF: predicated region fallthrough
CT: control target
= control target key end

     0   :  { %s2889_s0 = inlined_call_operand.vmem [shape: f32[16,16], index: 0, kind: input, shape index: {}]   ;;  %s2890_s1 = inlined_call_operand.vmem [shape: f32[16,4], index: 1, kind: input, shape index: {}]   ;;  %s2891_s2 = inlined_call_operand.vmem [shape: f32[128,8], index: 2, kind: input, shape index: {}]   ;;  %s2892_s3 = inlined_call_operand.vmem [shape: f32[16,32], index: 3, kind: input, shape index: {}]   ;;  %s2893_s4 = inlined_call_operand.vmem [shape: f32[1,32], index: 4, kind: input, shape index: {}]   ;;  %s2894_s5 = inlined_call_operand.vmem [shape: f32[32,32], index: 5, kind: input, shape index: {}]   ;;  %s2895_s6 = inlined_call_operand.vmem [shape: f32[1,32], index: 6, kind: input, shape index: {}]   ;;  %s2896_s7 = inlined_call_operand.vmem [shape: f32[32,16], index: 7, kind: input, shape index: {}]   ;;  %s2897_s8 = inlined_call_operand.vmem [shape: f32[1,16], index: 8, kind: input, shape index: {}]   ;;  %s2898_s9 = inlined_call_operand.vmem [shape: f32[8,32], index: 9, kind: input, shape index: {}]   ;;  %s2899_s10 = inlined_call_operand.vmem [shape: f32[4,32], index: 10, kind: input, shape index: {}]   ;;  %s2900_s11 = inlined_call_operand.vmem [shape: f32[1,32], index: 11, kind: input, shape index: {}]   ;;  %s2901_s12 = inlined_call_operand.vmem [shape: f32[32,32], index: 12, kind: input, shape index: {}]   ;;  %s2902_s13 = inlined_call_operand.vmem [shape: f32[1,32], index: 13, kind: input, shape index: {}]   ;;  %s2903_s14 = inlined_call_operand.vmem [shape: f32[32,12], index: 14, kind: input, shape index: {}]   ;;  %s2904_s15 = inlined_call_operand.vmem [shape: f32[1,12], index: 15, kind: input, shape index: {}]   ;;  %s2905_s16 = inlined_call_operand.hbm [shape: f32[16,16], index: 16, kind: output, shape index: {0}]   ;;  %s2906_s17 = inlined_call_operand.vmem [shape: f32[128,20], index: 17, kind: output, shape index: {1}]  }
   0x1   :  { %2914 = sst [smem:[#allocation8_spill]] %s2889_s0 }
   0x2   :  { %2915 = sst [smem:[#allocation9_spill]] %s2890_s1 }
   0x3   :  { %2916 = sst [smem:[#allocation10_spill]] %s2891_s2 }
   0x4   :  { %2917 = sst [smem:[#allocation11_spill]] %s2892_s3 }
   0x5   :  { %2918 = sst [smem:[#allocation12_spill]] %s2893_s4 }
   0x6   :  { %23 = vsyncpa [#allocation3], 0 }
   0x7   :  { %25 = vsyncpa [#allocation3 + $0x1], 0  ;;  %s2485_s24 = smov 0   ;;  %s2487_s25 = smov 0  }
   0x8   :  { %s2489_s26 = smov 0   ;;  %s2491_s27 = smov 0  }
   0x9 LB: > { %2919 = sst [smem:[#allocation5_spill]] %s2383_s26  ;;  %s2506_s28 = sadd.s32 4294967295, %s2387_s27   ;;  %s2387_s27 = sphi %s2491_s27, %s2932_s27   ;;  %s2383_s26 = sphi %s2489_s26, %s2934_s26   ;;  %s2379_s25 = sphi %s2487_s25, %s2936_s25   ;;  %s2375_s24 = sphi %s2485_s24, %s2935_s24  }
   0xa   : > { %s2061_s29 = sadd.s32 4294967294, %s2387_s27   ;;  %s2510_s0 = sadd.s32 1, %s2387_s27  }
   0xb   : > { %2920 = sst [smem:[#allocation6_spill]] %s2510_s0  ;;  %s389_s30 = sadd.s32 1, %s2383_s26 }
   0xc   : > { %s386_s18 = ssub.s32 %s2387_s27, %s2510_s0  ;;  %p399_p0 = scmp.ne.s32.totalorder %s2383_s26, %s2379_s25 }
   0xd   : > { %p387_p1 = scmp.eq.s32.totalorder %s386_s18, 0  ;;  %p400_p2 = scmp.eq.s32.totalorder %s2506_s28, 1 }
   0xe   : > { %p405_p3 = scmp.ne.s32.totalorder %s2379_s25, %s2375_s24  ;;  %p406_p4 = scmp.eq.s32.totalorder %s2061_s29, 1 }
   0xf   : > { %s2521_s19 = scalar_select %p387_p1, %s2383_s26, %s389_s30  }
  0x10   : > { %p2523_p5 = por %p400_p2, %p399_p0  ;;  %p2527_p6 = por %p406_p4, %p405_p3 }
  0x11   : > { %2921 = sst [smem:[#allocation7_spill]] %s2521_s19  ;;  %p2064_p7 = scmp.ge.s32.totalorder %s2387_s27, 1 }
  0x12   : > { %p512_p8 = scmp.lt.s32.totalorder %s2387_s27, 3 }
  0x14   : > { %p513_p9 = pnand %p2064_p7, %p512_p8 }
  0x15   : > { %s2924_s3 = sld [smem:[#allocation11_spill]] (!%p513_p9)  ;;  %p577_p10 = scmp.lt.s32.totalorder (!%p513_p9), %s2506_s28, 1 }
  0x16   : > { %516 = sbr.rel (%p513_p9) target bundleno = 1564 (0x61c), region = 84  ;;  %s2925_s29 = sld [smem:[#allocation8_spill]] (!%p513_p9) }
  0x17   : > { %s2926_s4 = sld [smem:[#allocation12_spill]] (!%p513_p9)  ;;  %s2068_s30 = sshll.u32 (!%p513_p9), %s2506_s28, 3 }
  0x18   : > { %p586_p11 = scmp.lt.s32.totalorder (!%p513_p9), %s2068_s30, 15  ;;  %s2927_s2 = sld [smem:[#allocation10_spill]] (!%p513_p9) }
  0x19   : > { %s2912_s23 = smov (!%p513_p9), 8  }
  0x1b   : > { %v600_v0 = vld [vmem:[%s2924_s3 + $0x8] sm:$0xff]  ;;  %v2389_v1 = vmov 0.0   ;;  %v599_v2 = vld [vmem:[%s2924_s3] sm:$0xff]  ;;  %vm2390_vm0 = vmmov 0   ;;  %v686_v3 = vld [vmem:[%s2894_s5 + $0x18] sm:$0xff]  ;;  %s2545_s19 = scalar_select %p577_p10, %s2506_s28, 1  ;;  %v870_v41 = vlaneseq }
  0x1c   : > { %2159 = vmatprep.subr.mxu0 %v2389_v1  ;;  %2163 = vmatprep.mubr.msk.f32.mxu0 %vm2390_vm0, %v2389_v1  ;;  %vm608_vm1 = vcmask 130048   ;;  %v685_v5 = vld [vmem:[%s2894_s5 + $0x10] sm:$0xff]  ;;  %v684_v6 = vld [vmem:[%s2894_s5 + $0x8] sm:$0xff]  ;;  %v683_v7 = vld [vmem:[%s2894_s5] sm:$0xff]  ;;  %vm694_vm2 = vcmask 261120   ;;  %s2938_s30 = smov (!%p586_p11, %s2068_s30), 15 }
  0x1d   : > { %2160 = vmatpush3.msra.mxu0 %v600_v0  ;;  %2166 = vmatprep.subr.mxu1 %v2389_v1  ;;  %s2066_s21 = sshll.u32 %s2545_s19, 3  ;;  %v772_v8 = vld [vmem:[%s2896_s7 + $0x18] sm:$0xff]  ;;  %v2072_v9 = vld [vmem:[%s2926_s4] ss:$0 sm:$0xff]  ;;  %v771_v14 = vld [vmem:[%s2896_s7 + $0x10] sm:$0xff]  ;;  %s2910_s18 = sshll.u32 %s2938_s30, 3 }
  0x1e   : > { %2161 = vmatprep.subr.mxu0 %v2389_v1  ;;  %2167 = vmatpush3.msra.mxu1 %v686_v3  ;;  %s580_s3 = scalar_lea.vmem %s2925_s29, %s2066_s21  ;;  %v770_v15 = vld [vmem:[%s2896_s7 + $0x8] sm:$0xff]  ;;  %v769_v16 = vld [vmem:[%s2896_s7] sm:$0xff]  ;;  %s589_s22 = scalar_lea.vmem %s2927_s2, %s2910_s18  ;;  %vm1137_vm3 = vcmask 1043456   ;;  %vm1133_vm4 = vcmask 31744   ;;  %v2392_v39 = vmov 1966171168  }
  0x1f   : > { %2162 = vmatpush3.msra.mxu0 %v599_v2  ;;  %2168 = vmatprep.subr.mxu1 %v2389_v1  ;;  %v597_v4 = vld [vmem:[%s580_s3] sm:$0xff]  ;;  %v859_v18 = vld [vmem:[%s589_s22 + $0x10] sm:$0xff]  ;;  %v858_v19 = vld [vmem:[%s589_s22 + $0x8] sm:$0xff]  ;;  %s2911_s19 = sand.u32 1, %s2379_s25   ;;  %v868_v40 = vunpack.c.l.s4 %v2392_v39  ;;  %v871_v43 = vshrl.u32 %v870_v41, 7  ;;  %s2929_s3 = sshll.u32 %s2938_s30, 3 }
  0x20   : > { %2174 = vmatprep.mubr.msk.f32.mxu1 %vm2390_vm0, %v2389_v1  ;;  %2177 = vmatprep.subr.mxu0 %v2389_v1  ;;  %v857_v17 = vld [vmem:[%s589_s22] sm:$0xff]  ;;  %v860_v20 = vld [vmem:[%s589_s22 + $0x18] sm:$0xff]  ;;  %v862_v22 = vld [vmem:[%s589_s22 + $0x28] sm:$0xff]  ;;  %s2669_s2 = scalar_lea.vmem %s2906_s17, %s2929_s3  ;;  %vm1302_vm5 = vcmask 64512   ;;  %vm1728_vm6 = vcmask 97280  }
  0x21   : > { %2164 = vmatmul.mubr.msk.f32.vlgmr.msra.gmra.mxu0 %vm608_vm1, %v597_v4  ;;  %2169 = vmatpush3.msra.mxu1 %v685_v5  ;;  %v861_v21 = vld [vmem:[%s589_s22 + $0x20] sm:$0xff]  ;;  %v863_v23 = vld [vmem:[%s589_s22 + $0x30] sm:$0xff]  ;;  %v864_v24 = vld [vmem:[%s589_s22 + $0x38] sm:$0xff]  ;;  %s2928_s22 = sld [smem:[#allocation9_spill]]  ;;  %v869_v42 = vunpack.c.0.s8 %v868_v40  ;;  %v2633_v50 = vsub.s32 0, %v871_v43 }
  0x22   : > { %2185 = vmatprep.mubr.msk.f32.mxu0 %vm2390_vm0, %v2389_v1  ;;  %2170 = vmatprep.subr.mxu1 %v2389_v1  ;;  %v2074_v25 = vld [vmem:[%s2895_s6] ss:$0 sm:$0xff] }
  0x23   : > { %2171 = vmatpush3.msra.mxu1 %v684_v6  ;;  %2178 = vmatpush3.msra.mxu0 %v772_v8  ;;  %v1125_v30 = vld [vmem:[%s2899_s10] sm:$0xf]  ;;  %v2630_v45 = vsub.s32 %v869_v42, %v871_v43 }
  0x24   : > { %2172 = vmatprep.subr.mxu1 %v2389_v1  ;;  %2179 = vmatprep.subr.mxu0 %v2389_v1  ;;  %v1301_v32 = vld [vmem:[%s2898_s9] sm:$0xff] }
  0x25   : > { %2173 = vmatpush3.msra.mxu1 %v683_v7  ;;  %2180 = vmatpush3.msra.mxu0 %v771_v14  ;;  %v2076_v33 = vld [vmem:[%s2897_s8] ss:$0 sm:$0xff] }
  0x26   : > { %2188 = vmatprep.subr.mxu1 %v2389_v1  ;;  %2181 = vmatprep.subr.mxu0 %v2389_v1 }
  0x27   : > { %2182 = vmatpush3.msra.mxu0 %v770_v15  ;;  %1053 = vrot.lane.b32.xlu0 %v857_v17, %s2912_s23  ;;  %s584_s18 = scalar_lea.vmem %s2928_s22, %s2066_s21  ;;  %s2617_s21 = sshll.u32 %s2911_s19, 3 }
  0x28   : > { %2183 = vmatprep.subr.mxu0 %v2389_v1  ;;  %1057 = vrot.lane.b32.xlu1 %v859_v18, %s2912_s23  ;;  %v598_v31 = vld [vmem:[%s584_s18] sm:$0xff]  ;;  %s569_s4 = scalar_lea.vmem [#allocation2], %s2617_s21  ;;  %s2393_s18 = smov 120  }
  0x29   : > { %2184 = vmatpush3.msra.mxu0 %v769_v16  ;;  %s2108_s22 = sshll.u32 %s2506_s28, 7  ;;  %s1949_s3 = sshll.u32 %s569_s4, 4  ;;  %s1950_s3 = int_to_ptr.vmem [resolvable:$true] %s1949_s3 }
  0x2a   : > { %2193 = vmatprep.subr.mxu0 %v1301_v32  ;;  %s2824_s30 = scalar_lea.hbm %s2905_s16, %s2108_s22  ;;  %s2327_s28 = scalar_lea.vmem %s1950_s3, 128 }
  0x2b   : > { %1055 = vrot.lane.b32.xlu0 %v858_v19, %s2912_s23  ;;  %p2328_p12 = scmp.ne.s32.totalorder %s1950_s3, %s2327_s28  ;;  %s2394_s21 = smov [#allocation2]  }
  0x2c   : > { %1059 = vrot.lane.b32.xlu1 %v860_v20, %s2912_s23 }
  0x2d   : > { %p2329_p13 = pnand %p2328_p12, %p2523_p5 }
  0x2f   : > { %1061 = vrot.lane.b32.xlu0 %v861_v21, %s2912_s23  ;;  %p2330_p0 = pneg %p2329_p13 }
  0x30   : > { %1063 = vrot.lane.b32.xlu1 %v862_v22, %s2912_s23 }
  0x33   : > { %1065 = vrot.lane.b32.xlu0 %v863_v23, %s2912_s23 }
  0x34   : > { %1067 = vrot.lane.b32.xlu1 %v864_v24, %s2912_s23 }
  0x99   : > { %v1054_v44 = vpop.permute.xlu0 %1053 }
  0x9a   : > { %v1058_v47 = vpop.permute.xlu1 %1057 }
  0x9d   : > { %v1056_v54 = vpop.permute.xlu0 %1055 }
  0x9e   : > { %v1060_v58 = vpop.permute.xlu1 %1059 }
  0xa1   : > { %v1062_v4 = vpop.permute.xlu0 %1061 }
  0xa2   : > { %v1064_v8 = vpop.permute.xlu1 %1063 }
  0xa5   : > { %v1066_v15 = vpop.permute.xlu0 %1065 }
  0xa6   : > { %v1068_v18 = vpop.permute.xlu1 %1067 }
  0xe1   : > { %v678_v10 = vpop.f32.mrf.mxu0 }
  0xe2   : > { %v679_v11 = vadd.f32 %v2072_v9, %v678_v10  ;;  %v2648_v9 = vld [vmem:[%s2901_s12 + $0x18] sm:$0xff] }
  0xe3   : > { %v2165_v12 = vpop.f32.mrf.mxu0 }
  0xe4   : > { %v682_v13 = vmax.f32 %v679_v11, 0.0 }
  0xe6   : > { %2175 = vmatmul.mubr.msk.f32.vlgmr.msra.gmra.mxu1 %vm694_vm2, %v682_v13 }
  0xe7   : > { %2190 = vmatprep.mubr.msk.f32.mxu1 %vm2390_vm0, %v2389_v1  ;;  %2189 = vmatpush3.msk.msra.mxu1 %vm1137_vm3, %v1125_v30 }
  0xe8   : > { %2247 = vmatprep.subr.mxu1 %v1301_v32 }
  0xea   : > { %2191 = vmatmul.mubr.msk.f32.vlgmr.msra.gmra.mxu1 %vm1133_vm4, %v598_v31 }
  0xeb   : > { %2248 = vmatpush3.msra.mxu1 %v1301_v32 }
  0xec   : > { %2207 = vmatprep.subr.mxu1 %v2648_v9 }
 0x1a6   : > { %v764_v26 = vpop.f32.mrf.mxu1 }
 0x1a7   : > { %v765_v27 = vadd.f32 %v2074_v25, %v764_v26 }
 0x1a8   : > { %v2176_v28 = vpop.f32.mrf.mxu1 }
 0x1a9   : > { %v768_v29 = vmax.f32 %v765_v27, 0.0 }
 0x1aa   : > { %v2654_v21 = vpop.f32.mrf.mxu1 }
 0x1ab   : > { %2186 = vmatmul.mubr.msk.f32.vlgmr.msra.gmra.mxu0 %vm694_vm2, %v768_v29 }
 0x1ac   : > { %2194 = vmatpush3.msra.mxu0 %v1301_v32  ;;  %v2192_v22 = vpop.f32.mrf.mxu1 }
 0x26b   : > { %v849_v34 = vpop.f32.mrf.mxu0 }
 0x26c   : > { %v2622_v35 = vadd.f32 %v2076_v33, %v849_v34 }
 0x26d   : > { %v2187_v36 = vpop.f32.mrf.mxu0 }
 0x26e   : > { %v854_v37 = vmul.f32 0.5, %v2622_v35  ;;  %853 = vst.msk [vmem:[%s569_s4] sm:$0xff] %vm608_vm1, %v2622_v35  ;;  %v873_v23 = vrot.slane %v2622_v35, %v2630_v45  ;;  %v866_v25 = vcombine.high %v2622_v35, %v2622_v35  ;;  %s2331_s4 = sshll.u32 %s2394_s21, 4  ;;  %s2332_s4 = int_to_ptr.vmem [resolvable:$false] %s2331_s4 }
 0x26f   : > { %s2333_s0 = scalar_lea.vmem %s2332_s4, 256  ;;  %p2334_p1 = scmp.lt.s32.totalorder %s1950_s3, %s2332_s4 }
 0x270   : > { %v855_v38 = vmul.f32 1.442695, %v854_v37  ;;  %v881_v24 = vcombine.high %v873_v23, %v873_v23  ;;  %v889_v26 = vrot.slane %v873_v23, %v2630_v45  ;;  %v880_v28 = vrot.slane %v866_v25, %v2630_v45  ;;  %p2335_p2 = scmp.lt.s32.totalorder %s2333_s0, %s2327_s28 }
 0x272   : > { %2293 = vpow2.f32 %v855_v38  ;;  %v903_v27 = vrot.slane %v881_v24, %v2630_v45  ;;  %v918_v29 = vrot.slane %v889_v26, %v2633_v50  ;;  %v911_v30 = vcombine.high %v889_v26, %v889_v26  ;;  %p2336_p3 = por %p2335_p2, %p2334_p1 }
 0x273   : > { %v882_v35 = vcombine.high %v880_v28, %v880_v28  ;;  %v896_v39 = vrot.slane %v880_v28, %v2630_v45 }
 0x274   : > { %v922_v33 = vrot.slane %v903_v27, %v2633_v50  ;;  %v913_v34 = vcombine.high %v903_v27, %v903_v27  ;;  %v926_v38 = vrot.slane %v911_v30, %v2633_v50  ;;  %p2337_p4 = pnand %p2336_p3, %p2330_p0 }
 0x275   : > { %v910_v43 = vrot.slane %v882_v35, %v2630_v45 }
 0x276   : > { %v930_v42 = vrot.slane %v913_v34, %v2633_v50 }
 0x27f   : > { %v2294_v46 = vpop.eup %2293 }
 0x280   : > { %v963_v48 = vrot.slane %v2294_v46, %v2630_v45  ;;  %v956_v49 = vcombine.high %v2294_v46, %v2294_v46 }
 0x282   : > { %v979_v51 = vrot.slane %v963_v48, %v2630_v45  ;;  %v971_v52 = vcombine.high %v963_v48, %v963_v48  ;;  %v970_v53 = vrot.slane %v956_v49, %v2630_v45  ;;  %v912_v48 = vcombine.high %v896_v39, %v896_v39 }
 0x284   : > { %v1008_v55 = vrot.slane %v979_v51, %v2633_v50  ;;  %v1001_v56 = vcombine.high %v979_v51, %v979_v51  ;;  %v993_v57 = vrot.slane %v971_v52, %v2630_v45  ;;  %v986_v59 = vrot.slane %v970_v53, %v2630_v45 }
 0x285   : > { %v972_v60 = vcombine.high %v970_v53, %v970_v53  ;;  %v938_v52 = vrot.slane %v910_v43, %v2633_v50  ;;  %v914_v53 = vcombine.high %v910_v43, %v910_v43 }
 0x286   : > { %v1077_v61 = vmul.f32 %v1054_v44, %v1008_v55  ;;  %v1016_v62 = vrot.slane %v1001_v56, %v2633_v50  ;;  %v1012_v63 = vrot.slane %v993_v57, %v2633_v50  ;;  %v1003_v0 = vcombine.high %v993_v57, %v993_v57 }
 0x287   : > { %v1000_v3 = vrot.slane %v972_v60, %v2630_v45  ;;  %v1024_v6 = vrot.slane %v986_v59, %v2633_v50  ;;  %v1002_v7 = vcombine.high %v986_v59, %v986_v59  ;;  %v942_v56 = vrot.slane %v912_v48, %v2633_v50 }
 0x288   : > { %v1078_v1 = vmul.f32 %v1056_v54, %v1012_v63  ;;  %v1020_v2 = vrot.slane %v1003_v0, %v2633_v50  ;;  %1093 = vrot.lane.b32.xlu0 %v1077_v61, %s2393_s18  ;;  %v1079_v5 = vmul.f32 %v1058_v47, %v1016_v62  ;;  %v934_v47 = vrot.slane %v896_v39, %v2633_v50  ;;  %v1442_v62 = vld [vmem:[%s2901_s12 + $0x10] sm:$0xff]  ;;  %v1441_v63 = vld [vmem:[%s2901_s12 + $0x8] sm:$0xff]  ;;  %v1440_v0 = vld [vmem:[%s2901_s12] sm:$0xff] }
 0x289   : > { %v1028_v11 = vrot.slane %v1000_v3, %v2633_v50  ;;  %v1004_v12 = vcombine.high %v1000_v3, %v1000_v3  ;;  %v1081_v13 = vmul.f32 %v1062_v4, %v1024_v6  ;;  %v1032_v14 = vrot.slane %v1002_v7, %v2633_v50 }
 0x28a   : > { %1095 = vrot.lane.b32.xlu1 %v1078_v1, %s2393_s18  ;;  %v1080_v10 = vmul.f32 %v1060_v58, %v1020_v2  ;;  %v946_v59 = vrot.slane %v914_v53, %v2633_v50  ;;  %v1591_v1 = vld [vmem:[%s2903_s14 + $0x18] sm:$0xff]  ;;  %v2078_v2 = vld [vmem:[%s2900_s11] ss:$0 sm:$0xff] }
 0x28b   : > { %v1082_v16 = vmul.f32 %v1064_v8, %v1028_v11  ;;  %v1036_v17 = vrot.slane %v1004_v12, %v2633_v50  ;;  %v1083_v19 = vmul.f32 %v1066_v15, %v1032_v14  ;;  %2227 = vmatprep.subr.mxu0 %v1591_v1  ;;  %v1208_v3 = vadd.f32 %v2078_v2, %v2654_v21 }
 0x28c   : > { %1097 = vrot.lane.b32.xlu0 %v1079_v5, %s2393_s18 }
 0x28d   : > { %v1084_v20 = vmul.f32 %v1068_v18, %v1036_v17  ;;  %v1219_v4 = vrot.slane %v1208_v3, %v2630_v45  ;;  %v1212_v6 = vcombine.high %v1208_v3, %v1208_v3 }
 0x28e   : > { %1099 = vrot.lane.b32.xlu1 %v1080_v10, %s2393_s18 }
 0x28f   : > { %v1227_v5 = vcombine.high %v1219_v4, %v1219_v4  ;;  %v1235_v8 = vrot.slane %v1219_v4, %v2630_v45 }
 0x290   : > { %1101 = vrot.lane.b32.xlu0 %v1081_v13, %s2393_s18 }
 0x291   : > { %v1249_v7 = vrot.slane %v1227_v5, %v2630_v45  ;;  %v1264_v12 = vrot.slane %v1235_v8, %v2633_v50  ;;  %v1257_v15 = vcombine.high %v1235_v8, %v1235_v8 }
 0x292   : > { %1103 = vrot.lane.b32.xlu1 %v1082_v16, %s2393_s18 }
 0x293   : > { %v1268_v10 = vrot.slane %v1249_v7, %v2633_v50  ;;  %v1259_v11 = vcombine.high %v1249_v7, %v1249_v7  ;;  %v1272_v23 = vrot.slane %v1257_v15, %v2633_v50 }
 0x294   : > { %1105 = vrot.lane.b32.xlu0 %v1083_v19, %s2393_s18 }
 0x295   : > { %v1276_v18 = vrot.slane %v1259_v11, %v2633_v50 }
 0x296   : > { %1107 = vrot.lane.b32.xlu1 %v1084_v20, %s2393_s18  ;;  %s2930_s18 = sand.u32 1, %s2379_s25  }
 0x297   : > { %s1931_s19 = scalar_lea.sflag [#allocation3], %s2930_s18 }
 0x2fa   : > { %v1094_v31 = vpop.permute.xlu0 %1093 }
 0x2fb   : > { %v1117_v32 = vadd.f32 %v1094_v31, %v918_v29 }
 0x2fc   : > { %v1096_v36 = vpop.permute.xlu1 %1095 }
 0x2fd   : > { %1881 = vst.msk [vmem:[%s2669_s2] sm:$0xff] %vm1302_vm5, %v1117_v32  ;;  %v1118_v37 = vadd.f32 %v1096_v36, %v922_v33  ;;  %2195 = vmatprep.mubr.msk.f32.mxu0 %vm1302_vm5, %v1117_v32 }
 0x2fe   : > { %v1098_v40 = vpop.permute.xlu0 %1097 }
 0x2ff   : > { %1882 = vst.msk [vmem:[%s2669_s2 + $0x8] sm:$0xff] %vm1302_vm5, %v1118_v37  ;;  %v1119_v41 = vadd.f32 %v1098_v40, %v926_v38  ;;  %2196 = vmatmul.mubr.msk.f32.vlgmr.msra.gmra.mxu0 %vm1302_vm5, %v1118_v37 }
 0x300   : > { %v1100_v44 = vpop.permute.xlu1 %1099  ;;  %2228 = vmatpush3.msra.mxu0 %v1591_v1 }
 0x301   : > { %1883 = vst.msk [vmem:[%s2669_s2 + $0x10] sm:$0xff] %vm1302_vm5, %v1119_v41  ;;  %v1120_v46 = vadd.f32 %v1100_v44, %v930_v42  ;;  %2198 = vmatprep.mubr.msk.f32.mxu0 %vm1302_vm5, %v1119_v41 }
 0x302   : > { %v1102_v49 = vpop.permute.xlu0 %1101 }
 0x303   : > { %1884 = vst.msk [vmem:[%s2669_s2 + $0x18] sm:$0xff] %vm1302_vm5, %v1120_v46  ;;  %v1121_v51 = vadd.f32 %v1102_v49, %v934_v47  ;;  %2199 = vmatmul.mubr.msk.f32.gmra.mxu0 %vm1302_vm5, %v1120_v46  ;;  %v1590_v49 = vld [vmem:[%s2903_s14 + $0x10] sm:$0xff] }
 0x304   : > { %v1104_v54 = vpop.permute.xlu1 %1103  ;;  %2229 = vmatprep.subr.mxu0 %v1590_v49 }
 0x305   : > { %1885 = vst.msk [vmem:[%s2669_s2 + $0x20] sm:$0xff] %vm1302_vm5, %v1121_v51  ;;  %v1122_v55 = vadd.f32 %v1104_v54, %v938_v52  ;;  %2201 = vmatprep.mubr.msk.f32.mxu1 %vm1302_vm5, %v1121_v51  ;;  %2230 = vmatpush3.msra.mxu0 %v1590_v49  ;;  %v1588_v51 = vld [vmem:[%s2903_s14] sm:$0xff] }
 0x306   : > { %v1106_v57 = vpop.permute.xlu0 %1105  ;;  %v2089_v52 = vld [vmem:[%s2902_s13] ss:$0 sm:$0xff] }
 0x307   : > { %1886 = vst.msk [vmem:[%s2669_s2 + $0x28] sm:$0xff] %vm1302_vm5, %v1122_v55  ;;  %v1123_v58 = vadd.f32 %v1106_v57, %v942_v56  ;;  %2202 = vmatmul.mubr.msk.f32.vlgmr.msra.gmra.mxu1 %vm1302_vm5, %v1122_v55 }
 0x308   : > { %v1108_v60 = vpop.permute.xlu1 %1107  ;;  %2208 = vmatpush3.msra.mxu1 %v2648_v9  ;;  %v1226_v9 = vrot.slane %v1212_v6, %v2630_v45 }
 0x309   : > { %1887 = vst.msk [vmem:[%s2669_s2 + $0x30] sm:$0xff] %vm1302_vm5, %v1123_v58  ;;  %v1124_v61 = vadd.f32 %v1108_v60, %v946_v59  ;;  %2204 = vmatprep.mubr.msk.f32.mxu1 %vm1302_vm5, %v1123_v58  ;;  %2209 = vmatprep.subr.mxu1 %v1442_v62 }
 0x30a   : > { %2210 = vmatpush3.msra.mxu1 %v1442_v62  ;;  %v1228_v14 = vcombine.high %v1226_v9, %v1226_v9  ;;  %v1242_v24 = vrot.slane %v1226_v9, %v2630_v45 }
 0x30b   : > { %1888 = vst.msk [vmem:[%s2669_s2 + $0x38] sm:$0xff] %vm1302_vm5, %v1124_v61  ;;  %2205 = vmatmul.mubr.msk.f32.gmra.mxu1 %vm1302_vm5, %v1124_v61  ;;  %2211 = vmatprep.subr.mxu1 %v1441_v63 }
 0x30c   : > { %2212 = vmatpush3.msra.mxu1 %v1441_v63  ;;  %v1256_v21 = vrot.slane %v1228_v14, %v2630_v45  ;;  %v1280_v33 = vrot.slane %v1242_v24, %v2633_v50  ;;  %v1258_v34 = vcombine.high %v1242_v24, %v1242_v24 }
 0x30d   : > { %2213 = vmatprep.subr.mxu1 %v1440_v0 }
 0x30e   : > { %2214 = vmatpush3.msra.mxu1 %v1440_v0  ;;  %v1284_v29 = vrot.slane %v1256_v21, %v2633_v50  ;;  %v1260_v31 = vcombine.high %v1256_v21, %v1256_v21  ;;  %v1288_v41 = vrot.slane %v1258_v34, %v2633_v50 }
 0x310   : > { %v1292_v38 = vrot.slane %v1260_v31, %v2633_v50  ;;  %v1589_v50 = vld [vmem:[%s2903_s14 + $0x8] sm:$0xff] }
 0x311   : > { %2231 = vmatprep.subr.mxu0 %v1589_v50 }
 0x312   : > { %2232 = vmatpush3.msra.mxu0 %v1589_v50 }
 0x313   : > { %2233 = vmatprep.subr.mxu0 %v1588_v51 }
 0x314   : > { %2234 = vmatpush3.msra.mxu0 %v1588_v51 }
 0x3bf   : > { %v2197_v13 = vpop.f32.mrf.mxu0 }
 0x3c0   : > { %v1399_v16 = vadd.f32 %v2197_v13, %v1268_v10  ;;  %v2098_v13 = vld [vmem:[%s2904_s15] ss:$0 sm:$0xff] }
 0x3c1   : > { %v1393_v17 = vpop.f32.mrf.mxu0 }
 0x3c2   : > { %v1394_v19 = vadd.f32 %v1393_v17, %v1264_v12  ;;  %v1433_v25 = vmax.f32 %v1399_v16, 0.0 }
 0x3c3   : > { %v2200_v20 = vpop.f32.mrf.mxu0 }
 0x3c4   : > { %v1432_v22 = vmax.f32 %v1394_v19, 0.0  ;;  %v1409_v26 = vadd.f32 %v2200_v20, %v1276_v18 }
 0x3c5   : > { %v1403_v27 = vpop.f32.mrf.mxu0 }
 0x3c6   : > { %v1404_v28 = vadd.f32 %v1403_v27, %v1272_v23  ;;  %2215 = vmatprep.mubr.msk.f32.mxu1 %vm694_vm2, %v1432_v22  ;;  %v1435_v35 = vmax.f32 %v1409_v26, 0.0 }
 0x3c7   : > { %v2203_v30 = vpop.f32.mrf.mxu1  ;;  %2216 = vmatmul.mubr.msk.f32.vlgmr.msra.gmra.mxu1 %vm694_vm2, %v1433_v25 }
 0x3c8   : > { %v1434_v32 = vmax.f32 %v1404_v28, 0.0  ;;  %v1419_v36 = vadd.f32 %v2203_v30, %v1284_v29 }
 0x3c9   : > { %v1413_v37 = vpop.f32.mrf.mxu1 }
 0x3ca   : > { %v1414_v45 = vadd.f32 %v1413_v37, %v1280_v33  ;;  %2218 = vmatprep.mubr.msk.f32.mxu1 %vm694_vm2, %v1434_v32  ;;  %v1437_v42 = vmax.f32 %v1419_v36, 0.0 }
 0x3cb   : > { %v2206_v39 = vpop.f32.mrf.mxu1  ;;  %2219 = vmatmul.mubr.msk.f32.gmra.mxu1 %vm694_vm2, %v1435_v35 }
 0x3cc   : > { %v1436_v40 = vmax.f32 %v1414_v45, 0.0  ;;  %v1429_v43 = vadd.f32 %v2206_v39, %v1292_v38 }
 0x3cd   : > { %v1423_v44 = vpop.f32.mrf.mxu1 }
 0x3ce   : > { %v1424_v46 = vadd.f32 %v1423_v44, %v1288_v41  ;;  %2221 = vmatprep.mubr.msk.f32.mxu1 %vm694_vm2, %v1436_v40  ;;  %v1439_v48 = vmax.f32 %v1429_v43, 0.0 }
 0x3cf   : > { %2222 = vmatmul.mubr.msk.f32.gmra.mxu1 %vm694_vm2, %v1437_v42 }
 0x3d0   : > { %v1438_v47 = vmax.f32 %v1424_v46, 0.0 }
 0x3d2   : > { %2224 = vmatprep.mubr.msk.f32.mxu1 %vm694_vm2, %v1438_v47 }
 0x3d3   : > { %2225 = vmatmul.mubr.msk.f32.gmra.mxu1 %vm694_vm2, %v1439_v48 }
 0x487   : > { %v2217_v53 = vpop.f32.mrf.mxu1 }
 0x488   : > { %v1547_v54 = vadd.f32 %v2217_v53, %v2089_v52 }
 0x489   : > { %v1541_v55 = vpop.f32.mrf.mxu1 }
 0x48a   : > { %v1542_v56 = vadd.f32 %v2089_v52, %v1541_v55  ;;  %v1581_v59 = vmax.f32 %v1547_v54, 0.0 }
 0x48b   : > { %v2220_v57 = vpop.f32.mrf.mxu1 }
 0x48c   : > { %v1580_v58 = vmax.f32 %v1542_v56, 0.0  ;;  %v1557_v60 = vadd.f32 %v2220_v57, %v2089_v52 }
 0x48d   : > { %v1551_v61 = vpop.f32.mrf.mxu1 }
 0x48e   : > { %v1552_v62 = vadd.f32 %v2089_v52, %v1551_v61  ;;  %2235 = vmatprep.mubr.msk.f32.mxu0 %vm694_vm2, %v1580_v58  ;;  %v1583_v1 = vmax.f32 %v1557_v60, 0.0 }
 0x48f   : > { %v2223_v63 = vpop.f32.mrf.mxu1  ;;  %2236 = vmatmul.mubr.msk.f32.vlgmr.msra.gmra.mxu0 %vm694_vm2, %v1581_v59 }
 0x490   : > { %v1582_v0 = vmax.f32 %v1552_v62, 0.0  ;;  %v1567_v2 = vadd.f32 %v2223_v63, %v2089_v52 }
 0x491   : > { %v1561_v3 = vpop.f32.mrf.mxu1 }
 0x492   : > { %v1562_v4 = vadd.f32 %v2089_v52, %v1561_v3  ;;  %2238 = vmatprep.mubr.msk.f32.mxu0 %vm694_vm2, %v1582_v0  ;;  %v1585_v7 = vmax.f32 %v1567_v2, 0.0 }
 0x493   : > { %v2226_v5 = vpop.f32.mrf.mxu1  ;;  %2239 = vmatmul.mubr.msk.f32.gmra.mxu0 %vm694_vm2, %v1583_v1 }
 0x494   : > { %v1584_v6 = vmax.f32 %v1562_v4, 0.0  ;;  %v1577_v8 = vadd.f32 %v2226_v5, %v2089_v52 }
 0x495   : > { %v1571_v9 = vpop.f32.mrf.mxu1 }
 0x496   : > { %v1572_v10 = vadd.f32 %v2089_v52, %v1571_v9  ;;  %2241 = vmatprep.mubr.msk.f32.mxu0 %vm694_vm2, %v1584_v6  ;;  %v1587_v12 = vmax.f32 %v1577_v8, 0.0 }
 0x497   : > { %2242 = vmatmul.mubr.msk.f32.gmra.mxu0 %vm694_vm2, %v1585_v7 }
 0x498   : > { %v1586_v11 = vmax.f32 %v1572_v10, 0.0 }
 0x49a   : > { %2244 = vmatprep.mubr.msk.f32.mxu0 %vm694_vm2, %v1586_v11 }
 0x49b   : > { %2245 = vmatmul.mubr.msk.f32.gmra.mxu0 %vm694_vm2, %v1587_v12 }
 0x54f   : > { %v2237_v14 = vpop.f32.mrf.mxu0 }
 0x550   : > { %v1695_v15 = vadd.f32 %v2237_v14, %v2098_v13 }
 0x551   : > { %v1689_v16 = vpop.f32.mrf.mxu0 }
 0x552   : > { %v1736_v17 = vsel %vm1728_vm6, %v1695_v15, -inf  ;;  %v1690_v18 = vadd.f32 %v2098_v13, %v1689_v16 }
 0x553   : > { %v1737_v19 = vrot.slane %v1736_v17, 4  ;;  %v2240_v20 = vpop.f32.mrf.mxu0 }
 0x554   : > { %v1729_v21 = vsel %vm1728_vm6, %v1690_v18, -inf  ;;  %v1705_v22 = vadd.f32 %v2240_v20, %v2098_v13 }
 0x555   : > { %v1738_v23 = vmax.f32 %v1736_v17, %v1737_v19  ;;  %v1730_v24 = vrot.slane %v1729_v21, 4  ;;  %v1699_v25 = vpop.f32.mrf.mxu0 }
 0x556   : > { %v1750_v26 = vsel %vm1728_vm6, %v1705_v22, -inf  ;;  %v2769_v27 = vadd.f32 %v2098_v13, %v1699_v25 }
 0x557   : > { %v1739_v28 = vrot.slane %v1738_v23, 2  ;;  %v1731_v29 = vmax.f32 %v1729_v21, %v1730_v24  ;;  %v1751_v30 = vrot.slane %v1750_v26, 4  ;;  %v2243_v31 = vpop.f32.mrf.mxu0 }
 0x558   : > { %v1743_v32 = vsel %vm1728_vm6, %v2769_v27, -inf  ;;  %v2773_v33 = vadd.f32 %v2243_v31, %v2098_v13 }
 0x559   : > { %v1740_v34 = vmax.f32 %v1738_v23, %v1739_v28  ;;  %v1732_v35 = vrot.slane %v1731_v29, 2  ;;  %v1752_v36 = vmax.f32 %v1750_v26, %v1751_v30  ;;  %v1744_v37 = vrot.slane %v1743_v32, 4  ;;  %v1709_v45 = vpop.f32.mrf.mxu0 }
 0x55a   : > { %v1764_v38 = vsel %vm1728_vm6, %v2773_v33, -inf  ;;  %v1710_v39 = vadd.f32 %v2098_v13, %v1709_v45 }
 0x55b   : > { %v1741_v40 = vrot.slane %v1740_v34, 1  ;;  %v1733_v41 = vmax.f32 %v1731_v29, %v1732_v35  ;;  %v1753_v42 = vrot.slane %v1752_v36, 2  ;;  %v1745_v43 = vmax.f32 %v1743_v32, %v1744_v37  ;;  %v2246_v44 = vpop.f32.mrf.mxu0 }
 0x55c   : > { %v1765_v46 = vrot.slane %v1764_v38, 4  ;;  %v1757_v47 = vsel %vm1728_vm6, %v1710_v39, -inf  ;;  %v1725_v48 = vadd.f32 %v2246_v44, %v2098_v13 }
 0x55d   : > { %v1742_v49 = vmax.f32 %v1740_v34, %v1741_v40  ;;  %v1734_v50 = vrot.slane %v1733_v41, 1  ;;  %v1754_v51 = vmax.f32 %v1752_v36, %v1753_v42  ;;  %v1746_v52 = vrot.slane %v1745_v43, 2  ;;  %v1719_v53 = vpop.f32.mrf.mxu0 }
 0x55e   : > { %v1766_v54 = vmax.f32 %v1764_v38, %v1765_v46  ;;  %v1758_v55 = vrot.slane %v1757_v47, 4  ;;  %v1778_v56 = vsel %vm1728_vm6, %v1725_v48, -inf  ;;  %v1720_v57 = vadd.f32 %v2098_v13, %v1719_v53 }
 0x55f   : > { %v1786_v58 = vsub.f32 %v1695_v15, %v1742_v49  ;;  %v1735_v59 = vmax.f32 %v1733_v41, %v1734_v50  ;;  %v1755_v60 = vrot.slane %v1754_v51, 1  ;;  %v1747_v61 = vmax.f32 %v1745_v43, %v1746_v52 }
 0x560   : > { %v1767_v62 = vrot.slane %v1766_v54, 2  ;;  %v1759_v63 = vmax.f32 %v1757_v47, %v1758_v55  ;;  %v1779_v0 = vrot.slane %v1778_v56, 4  ;;  %v1771_v1 = vsel %vm1728_vm6, %v1720_v57, -inf }
 0x561   : > { %v1795_v2 = vmul.f32 1.442695, %v1786_v58  ;;  %v1785_v3 = vsub.f32 %v1690_v18, %v1735_v59  ;;  %v1756_v4 = vmax.f32 %v1754_v51, %v1755_v60  ;;  %v1748_v5 = vrot.slane %v1747_v61, 1 }
 0x562   : > { %v1768_v6 = vmax.f32 %v1766_v54, %v1767_v62  ;;  %v1760_v7 = vrot.slane %v1759_v63, 2  ;;  %v1780_v8 = vmax.f32 %v1778_v56, %v1779_v0  ;;  %v1772_v9 = vrot.slane %v1771_v1, 4 }
 0x563   : > { %2295 = vpow2.f32 %v1795_v2  ;;  %v1793_v10 = vmul.f32 1.442695, %v1785_v3  ;;  %v1788_v11 = vsub.f32 %v1705_v22, %v1756_v4  ;;  %v1749_v12 = vmax.f32 %v1747_v61, %v1748_v5 }
 0x564   : > { %v1769_v13 = vrot.slane %v1768_v6, 1  ;;  %v1761_v14 = vmax.f32 %v1759_v63, %v1760_v7  ;;  %v1781_v15 = vrot.slane %v1780_v8, 2  ;;  %v1773_v16 = vmax.f32 %v1771_v1, %v1772_v9 }
 0x565   : > { %2297 = vpow2.f32 %v1793_v10  ;;  %v1799_v17 = vmul.f32 1.442695, %v1788_v11  ;;  %v1787_v19 = vsub.f32 %v2769_v27, %v1749_v12 }
 0x566   : > { %v1770_v20 = vmax.f32 %v1768_v6, %v1769_v13  ;;  %v1762_v18 = vrot.slane %v1761_v14, 1  ;;  %v1782_v21 = vmax.f32 %v1780_v8, %v1781_v15  ;;  %v1774_v23 = vrot.slane %v1773_v16, 2 }
 0x567   : > { %2299 = vpow2.f32 %v1799_v17  ;;  %v1797_v24 = vmul.f32 1.442695, %v1787_v19 }
 0x568   : > { %v1790_v25 = vsub.f32 %v2773_v33, %v1770_v20  ;;  %v1763_v26 = vmax.f32 %v1761_v14, %v1762_v18  ;;  %v1783_v28 = vrot.slane %v1782_v21, 1  ;;  %v1775_v22 = vmax.f32 %v1773_v16, %v1774_v23 }
 0x569   : > { %2301 = vpow2.f32 %v1797_v24 }
 0x56a   : > { %v1803_v29 = vmul.f32 1.442695, %v1790_v25  ;;  %v1789_v30 = vsub.f32 %v1710_v39, %v1763_v26  ;;  %v1784_v31 = vmax.f32 %v1782_v21, %v1783_v28  ;;  %v1776_v32 = vrot.slane %v1775_v22, 1 }
 0x56c   : > { %2303 = vpow2.f32 %v1803_v29  ;;  %v1801_v34 = vmul.f32 1.442695, %v1789_v30  ;;  %v1792_v35 = vsub.f32 %v1725_v48, %v1784_v31  ;;  %v1777_v27 = vmax.f32 %v1775_v22, %v1776_v32 }
 0x56e   : > { %2305 = vpow2.f32 %v1801_v34  ;;  %v1807_v36 = vmul.f32 1.442695, %v1792_v35  ;;  %v1791_v37 = vsub.f32 %v1720_v57, %v1777_v27 }
 0x570   : > { %v2782_v45 = vpop.eup %2295  ;;  %2307 = vpow2.f32 %v1807_v36  ;;  %v1805_v38 = vmul.f32 1.442695, %v1791_v37 }
 0x571   : > { %v1816_v33 = vsel %vm1728_vm6, %v2782_v45, 0.0 }
 0x572   : > { %v2786_v40 = vpop.eup %2297  ;;  %v1817_v41 = vrot.slane %v1816_v33, 4  ;;  %2309 = vpow2.f32 %v1805_v38 }
 0x573   : > { %v1809_v39 = vsel %vm1728_vm6, %v2786_v40, 0.0 }
 0x574   : > { %v2790_v42 = vpop.eup %2299  ;;  %v1818_v43 = vadd.f32 %v1817_v41, %v1816_v33  ;;  %v1810_v44 = vrot.slane %v1809_v39, 4 }
 0x575   : > { %v1830_v46 = vsel %vm1728_vm6, %v2790_v42, 0.0 }
 0x576   : > { %v2794_v47 = vpop.eup %2301  ;;  %v1819_v48 = vrot.slane %v1818_v43, 2  ;;  %v1811_v49 = vadd.f32 %v1810_v44, %v1809_v39  ;;  %v1831_v50 = vrot.slane %v1830_v46, 4 }
 0x577   : > { %v1823_v51 = vsel %vm1728_vm6, %v2794_v47, 0.0 }
 0x578   : > { %v1812_v52 = vrot.slane %v1811_v49, 2  ;;  %v1832_v53 = vadd.f32 %v1831_v50, %v1830_v46  ;;  %v1824_v54 = vrot.slane %v1823_v51, 4  ;;  %v1820_v55 = vadd.f32 %v1819_v48, %v1818_v43 }
 0x579   : > { %v2798_v56 = vpop.eup %2303 }
 0x57a   : > { %v1833_v57 = vrot.slane %v1832_v53, 2  ;;  %v1825_v58 = vadd.f32 %v1824_v54, %v1823_v51  ;;  %v1844_v59 = vsel %vm1728_vm6, %v2798_v56, 0.0  ;;  %v1821_v60 = vrot.slane %v1820_v55, 1 }
 0x57b   : > { %v2802_v61 = vpop.eup %2305  ;;  %v1845_v62 = vrot.slane %v1844_v59, 4  ;;  %v1813_v63 = vadd.f32 %v1812_v52, %v1811_v49 }
 0x57c   : > { %v1826_v0 = vrot.slane %v1825_v58, 2  ;;  %v1837_v1 = vsel %vm1728_vm6, %v2802_v61, 0.0  ;;  %v1822_v2 = vadd.f32 %v1821_v60, %v1820_v55  ;;  %v1834_v3 = vadd.f32 %v1833_v57, %v1832_v53 }
 0x57d   : > { %v2806_v4 = vpop.eup %2307  ;;  %v1846_v5 = vadd.f32 %v1845_v62, %v1844_v59  ;;  %v1838_v6 = vrot.slane %v1837_v1, 4  ;;  %v1814_v7 = vrot.slane %v1813_v63, 1 }
 0x57e   : > { %v1858_v8 = vsel %vm1728_vm6, %v2806_v4, 0.0  ;;  %2311 = vrcp.f32 %v1822_v2  ;;  %v1835_v9 = vrot.slane %v1834_v3, 1  ;;  %v1827_v10 = vadd.f32 %v1826_v0, %v1825_v58 }
 0x57f   : > { %v2810_v11 = vpop.eup %2309  ;;  %v1847_v12 = vrot.slane %v1846_v5, 2  ;;  %v1839_v13 = vadd.f32 %v1838_v6, %v1837_v1  ;;  %v1859_v14 = vrot.slane %v1858_v8, 4  ;;  %v1815_v15 = vadd.f32 %v1814_v7, %v1813_v63 }
 0x580   : > { %v1851_v16 = vsel %vm1728_vm6, %v2810_v11, 0.0  ;;  %v1836_v17 = vadd.f32 %v1835_v9, %v1834_v3  ;;  %v1828_v19 = vrot.slane %v1827_v10, 1 }
 0x581   : > { %v1840_v20 = vrot.slane %v1839_v13, 2  ;;  %v1860_v18 = vadd.f32 %v1859_v14, %v1858_v8  ;;  %v1852_v21 = vrot.slane %v1851_v16, 4  ;;  %2313 = vrcp.f32 %v1815_v15 }
 0x582   : > { %2315 = vrcp.f32 %v1836_v17  ;;  %v1829_v23 = vadd.f32 %v1828_v19, %v1827_v10  ;;  %v1848_v24 = vadd.f32 %v1847_v12, %v1846_v5 }
 0x583   : > { %v1861_v25 = vrot.slane %v1860_v18, 2  ;;  %v1853_v26 = vadd.f32 %v1852_v21, %v1851_v16  ;;  %v1841_v28 = vadd.f32 %v1840_v20, %v1839_v13 }
 0x584   : > { %2317 = vrcp.f32 %v1829_v23  ;;  %v1849_v22 = vrot.slane %v1848_v24, 1 }
 0x585   : > { %v1854_v29 = vrot.slane %v1853_v26, 2  ;;  %v1842_v30 = vrot.slane %v1841_v28, 1  ;;  %v1862_v31 = vadd.f32 %v1861_v25, %v1860_v18 }
 0x586   : > { %v1850_v32 = vadd.f32 %v1849_v22, %v1848_v24 }
 0x587   : > { %v1843_v34 = vadd.f32 %v1842_v30, %v1841_v28  ;;  %v1863_v35 = vrot.slane %v1862_v31, 1  ;;  %v1855_v27 = vadd.f32 %v1854_v29, %v1853_v26 }
 0x588   : > { %2319 = vrcp.f32 %v1850_v32 }
 0x589   : > { %2321 = vrcp.f32 %v1843_v34  ;;  %v1864_v36 = vadd.f32 %v1863_v35, %v1862_v31  ;;  %v1856_v37 = vrot.slane %v1855_v27, 1 }
 0x58b   : > { %v2312_v38 = vpop.eup %2311  ;;  %2323 = vrcp.f32 %v1864_v36  ;;  %v1857_v33 = vadd.f32 %v1856_v37, %v1855_v27 }
 0x58c   : > { %v1868_v41 = vmul.f32 %v2312_v38, %v2782_v45 }
 0x58d   : > { %2325 = vrcp.f32 %v1857_v33 }
 0x58e   : > { %v2314_v39 = vpop.eup %2313  ;;  %1899 = vrot.lane.b32.xlu1 %v1868_v41, %s2912_s23 }
 0x58f   : > { %v2316_v43 = vpop.eup %2315  ;;  %v1866_v44 = vmul.f32 %v2314_v39, %v2786_v40 }
 0x590   : > { %v1872_v46 = vmul.f32 %v2316_v43, %v2790_v42 }
 0x591   : > { %v2318_v48 = vpop.eup %2317  ;;  %1897 = vrot.lane.b32.xlu0 %v1866_v44, %s2912_s23 }
 0x592   : > { %1903 = vrot.lane.b32.xlu1 %v1872_v46, %s2912_s23  ;;  %v1870_v45 = vmul.f32 %v2318_v48, %v2794_v47 }
 0x593   : > { %2340 = shalt.err (!%p2337_p4)
}
 0x594   : > { %s2341_s22 = scalar_lea.hbm %s2824_s30, 128  ;;  %s2345_s18 = scalar_lea.hbm %s2905_s16, 256 }
 0x595   : > { %p2342_p7 = scmp.ne.s32.totalorder %s2824_s30, %s2341_s22  ;;  %p2346_p10 = scmp.lt.s32.totalorder %s2824_s30, %s2905_s16 }
 0x596   : > { %p2347_p11 = scmp.lt.s32.totalorder %s2345_s18, %s2341_s22 }
 0x597   : > { %p2343_p8 = pnand %p2342_p7, %p2523_p5 }
 0x598   : > { %p2348_p12 = por %p2347_p11, %p2346_p10 }
 0x599   : > { %p2344_p9 = pneg %p2343_p8 }
 0x59b   : > { %p2349_p13 = pnand %p2348_p12, %p2344_p9 }
 0x59d   : > { %2352 = shalt.err (!%p2349_p13)
}
 0x59e   : > { %2249 = dma.vmem_to_hbm [thread:$0]  (%p2523_p5), %s1950_s3, 128, %s2824_s30, %s1931_s19   ;;  %v2320_v40 = vpop.eup %2319  ;;  %vm1921_vm7 = vcmask 162880  }
 0x59f   : > { %s2931_s28 = smov 8   ;;  %v2322_v42 = vpop.eup %2321  ;;  %v1876_v47 = vmul.f32 %v2320_v40, %v2798_v56 }
 0x5a0   : > { %1901 = vrot.lane.b32.xlu0 %v1870_v45, %s2931_s28  ;;  %v1874_v49 = vmul.f32 %v2322_v42, %v2802_v61  ;;  %v2324_v50 = vpop.eup %2323 }
 0x5a1   : > { %1907 = vrot.lane.b32.xlu1 %v1876_v47, %s2931_s28  ;;  %v1880_v51 = vmul.f32 %v2324_v50, %v2806_v4  ;;  %v2326_v52 = vpop.eup %2325 }
 0x5a2   : > { %v1878_v53 = vmul.f32 %v2326_v52, %v2810_v11 }
 0x5a4   : > { %1905 = vrot.lane.b32.xlu0 %v1874_v49, %s2931_s28 }
 0x5a5   : > { %1911 = vrot.lane.b32.xlu1 %v1880_v51, %s2931_s28 }
 0x5a8   : > { %1909 = vrot.lane.b32.xlu0 %v1878_v53, %s2931_s28 }
 0x600   : > { %v1900_v54 = vpop.permute.xlu1 %1899 }
 0x601   : > { %1923 = vst.msk [vmem:[%s2669_s2 + $0x8] sm:$0xff] %vm1921_vm7, %v1900_v54 }
 0x603   : > { %v1898_v55 = vpop.permute.xlu0 %1897 }
 0x604   : > { %1922 = vst.msk [vmem:[%s2669_s2] sm:$0xff] %vm1921_vm7, %v1898_v55  ;;  %v1904_v56 = vpop.permute.xlu1 %1903 }
 0x605   : > { %1925 = vst.msk [vmem:[%s2669_s2 + $0x18] sm:$0xff] %vm1921_vm7, %v1904_v56 }
 0x612   : > { %v1902_v57 = vpop.permute.xlu0 %1901 }
 0x613   : > { %1924 = vst.msk [vmem:[%s2669_s2 + $0x10] sm:$0xff] %vm1921_vm7, %v1902_v57  ;;  %v1908_v58 = vpop.permute.xlu1 %1907 }
 0x614   : > { %1927 = vst.msk [vmem:[%s2669_s2 + $0x28] sm:$0xff] %vm1921_vm7, %v1908_v58 }
 0x616   : > { %v1906_v59 = vpop.permute.xlu0 %1905 }
 0x617   : > { %1926 = vst.msk [vmem:[%s2669_s2 + $0x20] sm:$0xff] %vm1921_vm7, %v1906_v59  ;;  %v1912_v60 = vpop.permute.xlu1 %1911 }
 0x618   : > { %1929 = vst.msk [vmem:[%s2669_s2 + $0x38] sm:$0xff] %vm1921_vm7, %v1912_v60 }
 0x61a   : > { %v1910_v61 = vpop.permute.xlu0 %1909 }
 0x61b   : > { %1928 = vst.msk [vmem:[%s2669_s2 + $0x30] sm:$0xff] %vm1921_vm7, %v1910_v61 }
 0x61c PF: > { %p2255_p5 = scmp.ge.s32.totalorder %s2387_s27, 2  ;;  %s1965_s1 = sand.u32 1, %s2375_s24  }
 0x61d   : > { %s1966_s23 = scalar_lea.sflag [#allocation3], %s1965_s1 }
 0x61e   : > { %p2252_p0 = pnand %p2255_p5, %p2527_p6 }
 0x620   : > { %p2253_p1 = pneg %p2252_p0 }
 0x622   : > { %2370 = dma.done.wait (%p2253_p1), %s1966_s23, 128  }
 0x623   : > { %2372 = vsyncadd (%p2253_p1), %s1966_s23, 4294967168  ;;  %s2932_s27 = sld [smem:[#allocation6_spill]]  ;;  %s2935_s24 = smov %s2379_s25 }
 0x624   : > { %s2933_s3 = sld [smem:[#allocation5_spill]] }
 0x625   : > { %s2934_s26 = sld [smem:[#allocation7_spill]] }
 0x629   : > { %p28_p2 = scmp.ge.s32.totalorder %s2932_s27, 4  }
 0x62a   : > { %s2936_s25 = smov %s2933_s3 }
 0x62b   :  { %30 = sbr.rel (!%p28_p2) target bundleno = 9 (0x9), region = 137 }
 0x630   :  { %1979 = vsyncpa [#allocation3], 1 }
 0x631   :  { %1981 = vsyncpa [#allocation3 + $0x1], 1 }

</bundles_post_ra>
